<compile_context>
chip_gen: v7x
topology: tpu7x:2x2x1
jax: 0.10.0
libtpu: 0.0.40
codegen_flags: <defaults>
</compile_context>

<pallas_src>
import jax
import jax.numpy as jnp
from jax.experimental import pallas as pl
from jax.experimental.pallas import tpu as pltpu

# ---- config (mimics ac_config for the non-LSTM branch) ----
N_FEATURES = 1664          # 400 eeg + 1200 eog + 64 emg (split points 400/1600)
N_HIDDEN   = 32
N_CLASSES  = 5
SEGSIZE    = 8

OUT_PAD    = 128           # lane-dense logits slab width (>= N_CLASSES)
TM_MAX     = 256           # 256*8*1664*4B ~= 13.6 MB / buffer -> double-buffers
                           # comfortably inside v7x's 64 MiB VMEM (do NOT raise for v7x)


def _round_up(x, m):
    return (x + m - 1) // m * m


# ------------------------------------------------------------------
# One-time parameter preparation (hoisted out of the hot forward path)
# ------------------------------------------------------------------
def prepare_params(wh, bh, wo, bo):
    """wh: [H, F], bh: [H], wo: [C, H], bo: [C]  (torch Linear layout)."""
    wh_t = (wh.T / float(SEGSIZE)).astype(jnp.float32)           # fold 1/SEGSIZE of the mean
    bh_row = bh.reshape(1, N_HIDDEN).astype(jnp.float32)
    wo_pad = jnp.zeros((N_HIDDEN, OUT_PAD), jnp.float32).at[:, :N_CLASSES].set(wo.T)
    bo_pad = jnp.zeros((1, OUT_PAD), jnp.float32).at[0, :N_CLASSES].set(bo)
    return dict(wh_t=wh_t, bh=bh_row, wo_pad=wo_pad, bo_pad=bo_pad)


# ------------------------------------------------------------------
# Fused kernel: fc_hidden matmul -> segment reduce -> ReLU -> fc_out
#   x_ref : [TM*SEGSIZE, F]   one row tile of the raw input (2D view)
#   wh    : [F, H] (already scaled by 1/SEGSIZE), bh: [1, H]
#   wo    : [H, OUT_PAD], bo: [1, OUT_PAD]
#   o_ref : [TM, OUT_PAD]     lane-dense logits slab
# ------------------------------------------------------------------
def fused_sc_kernel(x_ref, wh_ref, bh_ref, wo_ref, bo_ref, o_ref):
    tm = o_ref.shape[0]
    # MXU first: [tm*8, 1664] @ [1664, 32] with f32 accumulation.
    h_seg = jnp.dot(x_ref[...], wh_ref[...], preferred_element_type=jnp.float32)
    # Segment reduction now only touches 32 lanes (mean's 1/8 already in wh).
    h = jnp.sum(h_seg.reshape(tm, SEGSIZE, N_HIDDEN), axis=1)
    h = jnp.maximum(h + bh_ref[...], 0.0)
    out = jnp.dot(h, wo_ref[...], preferred_element_type=jnp.float32) + bo_ref[...]
    o_ref[...] = out.astype(o_ref.dtype)


def _pick_tm(rows):
    """Row tile with NO host-side padding:
       - tiny row counts -> one full-extent block (always layout-legal),
       - otherwise an 8-aligned tile; the last grid step may be a clipped partial
         block (its tail rows never reach the output array),
       - prefer >= 2 grid steps so both v7x TensorCores get work."""
    if rows < 16:
        return rows
    tm = min(TM_MAX, (rows // 8) * 8)
    if pl.cdiv(rows, tm) < 2:
        tm = _round_up(pl.cdiv(rows, 2), 8)
    return tm


# ------------------------------------------------------------------
# SCModel.forward (non-LSTM branch), one pallas_call over a row-tiled grid
# ------------------------------------------------------------------
def sc_model_forward(inputs, params):
    """inputs: [batch, n_seg*SEGSIZE, N_FEATURES] -> logits [batch*n_seg, N_CLASSES] (f32)."""
    batch = inputs.shape[0]
    x = inputs.reshape(batch, -1, SEGSIZE, N_FEATURES)            # [B, n_seg, seg, F]
    n_seg = x.shape[1]
    rows = batch * n_seg
    x2 = x.reshape(rows * SEGSIZE, N_FEATURES)                    # layout-free 2D view

    tm = _pick_tm(rows)
    grid = pl.cdiv(rows, tm)

    logits_pad = pl.pallas_call(
        fused_sc_kernel,
        out_shape=jax.ShapeDtypeStruct((rows, OUT_PAD), jnp.float32),
        grid=(grid,),
        in_specs=[
            pl.BlockSpec((tm * SEGSIZE, N_FEATURES), lambda i: (i, 0)),  # row tile
            pl.BlockSpec((N_FEATURES, N_HIDDEN), lambda i: (0, 0)),      # VMEM-resident
            pl.BlockSpec((1, N_HIDDEN), lambda i: (0, 0)),               # VMEM-resident
            pl.BlockSpec((N_HIDDEN, OUT_PAD), lambda i: (0, 0)),         # VMEM-resident
            pl.BlockSpec((1, OUT_PAD), lambda i: (0, 0)),                # VMEM-resident
        ],
        out_specs=pl.BlockSpec((tm, OUT_PAD), lambda i: (i, 0)),
        compiler_params=pltpu.CompilerParams(
            dimension_semantics=("parallel",),        # rows split across TCs on v7x
            vmem_limit_bytes=48 * 1024 * 1024,        # > default scoped, < v7x 64 MiB
        ),
    )(x2, params["wh_t"], params["bh"], params["wo_pad"], params["bo_pad"])

    return logits_pad[:, :N_CLASSES]                  # cost-free XLA lane slice


if __name__ == "__main__":
    key = jax.random.PRNGKey(0)
    k_wh, k_wo, k1, k2 = jax.random.split(key, 4)

    # deterministic parameter init mirroring the torch __init__
    wh = jax.random.truncated_normal(k_wh, -2.0, 2.0,
                                     (N_HIDDEN, N_FEATURES), jnp.float32) * 0.04
    bh = jnp.full((N_HIDDEN,), 0.01, jnp.float32)
    wo = jax.random.truncated_normal(k_wo, -2.0, 2.0,
                                     (N_CLASSES, N_HIDDEN), jnp.float32) * 0.04
    bo = jnp.full((N_CLASSES,), 0.01, jnp.float32)

    params = prepare_params(wh, bh, wo, bo)           # one-time prep, off the hot path
    fwd = jax.jit(sc_model_forward)

    def reference(inputs):
        b = inputs.shape[0]
        xr = inputs.reshape(b, -1, SEGSIZE, N_FEATURES).reshape(-1, SEGSIZE, N_FEATURES)
        hc = jnp.concatenate([xr[:, :, :400].mean(1),
                              xr[:, :, 400:1600].mean(1),
                              xr[:, :, 1600:].mean(1)], axis=1)
        return jnp.maximum(hc @ wh.T + bh, 0.0) @ wo.T + bo

    # case 1: tiny batch  -> single full-extent block
    # case 2: larger batch -> 2 grid steps incl. a clipped partial tail block
    for k, (batch, n_seg) in ((k1, (2, 2)), (k2, (4, 10))):
        T = n_seg * SEGSIZE
        inputs = jax.random.normal(k, (batch, T, N_FEATURES), dtype=jnp.float32)
        logits = jax.block_until_ready(fwd(inputs, params))
        ref = reference(inputs)
        assert logits.shape == (batch * n_seg, N_CLASSES)
        assert logits.dtype == jnp.float32
        assert jnp.allclose(logits, ref, atol=1e-3, rtol=1e-3), \
            float(jnp.max(jnp.abs(logits - ref)))

    print("KERNEL_OK")
</pallas_src>

<mosaic_0001>
module attributes {stable_mosaic.version = 11 : i64} {
  func.func @fused_sc_kernel(%arg0: i32, %arg1: memref<32x1664xf32, #tpu.memory_space<vmem>>, %arg2: memref<1664x32xf32, #tpu.memory_space<vmem>>, %arg3: memref<1x32xf32, #tpu.memory_space<vmem>>, %arg4: memref<32x128xf32, #tpu.memory_space<vmem>>, %arg5: memref<1x128xf32, #tpu.memory_space<vmem>>, %arg6: memref<4x128xf32, #tpu.memory_space<vmem>>) attributes {dimension_semantics = [#tpu.dimension_semantics<parallel>], iteration_bounds = array<i64: 1>, scalar_prefetch = 0 : i64, scratch_operands = 0 : i64, tpu.core_type = #tpu.core_type<tc>, window_params = [{transform_indices = @transform_0, window_bounds = array<i64: 32, 1664>}, {pipeline_mode = #tpu.pipeline_mode<synchronous>, transform_indices = @transform_1, window_bounds = array<i64: 1664, 32>}, {pipeline_mode = #tpu.pipeline_mode<synchronous>, transform_indices = @transform_2, window_bounds = array<i64: 1, 32>}, {pipeline_mode = #tpu.pipeline_mode<synchronous>, transform_indices = @transform_3, window_bounds = array<i64: 32, 128>}, {pipeline_mode = #tpu.pipeline_mode<synchronous>, transform_indices = @transform_4, window_bounds = array<i64: 1, 128>}, {transform_indices = @transform_5, window_bounds = array<i64: 4, 128>}]} {
    %c0 = arith.constant 0 : index
    %c0_0 = arith.constant 0 : index
    %0 = vector.load %arg1[%c0, %c0_0] : memref<32x1664xf32, #tpu.memory_space<vmem>>, vector<32x1664xf32>
    %c0_1 = arith.constant 0 : index
    %c0_2 = arith.constant 0 : index
    %1 = vector.load %arg2[%c0_1, %c0_2] : memref<1664x32xf32, #tpu.memory_space<vmem>>, vector<1664x32xf32>
    %cst = arith.constant dense<0.000000e+00> : vector<32x32xf32>
    %2 = tpu.matmul %0, %1, %cst {dimension_numbers = #tpu.dot_dimension_numbers<[1], [0], [0], [1], [0, 0, 1, 1], [], []>} : vector<32x1664xf32>, vector<1664x32xf32>, vector<32x32xf32> -> vector<32x32xf32>
    %3 = vector.shape_cast %2 : vector<32x32xf32> to vector<4x8x32xf32>
    %cst_3 = arith.constant dense<0.000000e+00> : vector<4x32xf32>
    %4 = vector.multi_reduction <add>, %3, %cst_3 [1] : vector<4x8x32xf32> to vector<4x32xf32>
    %c0_4 = arith.constant 0 : index
    %c0_5 = arith.constant 0 : index
    %5 = vector.load %arg3[%c0_4, %c0_5] : memref<1x32xf32, #tpu.memory_space<vmem>>, vector<1x32xf32>
    %6 = vector.broadcast %5 : vector<1x32xf32> to vector<4x32xf32>
    %7 = arith.addf %4, %6 : vector<4x32xf32>
    %cst_6 = arith.constant 0.000000e+00 : f32
    %8 = vector.broadcast %cst_6 : f32 to vector<4x32xf32>
    %9 = arith.maximumf %7, %8 : vector<4x32xf32>
    %c0_7 = arith.constant 0 : index
    %c0_8 = arith.constant 0 : index
    %10 = vector.load %arg4[%c0_7, %c0_8] : memref<32x128xf32, #tpu.memory_space<vmem>>, vector<32x128xf32>
    %cst_9 = arith.constant dense<0.000000e+00> : vector<4x128xf32>
    %11 = tpu.matmul %9, %10, %cst_9 {dimension_numbers = #tpu.dot_dimension_numbers<[1], [0], [0], [1], [0, 0, 1, 1], [], []>} : vector<4x32xf32>, vector<32x128xf32>, vector<4x128xf32> -> vector<4x128xf32>
    %c0_10 = arith.constant 0 : index
    %c0_11 = arith.constant 0 : index
    %12 = vector.load %arg5[%c0_10, %c0_11] : memref<1x128xf32, #tpu.memory_space<vmem>>, vector<1x128xf32>
    %13 = vector.broadcast %12 : vector<1x128xf32> to vector<4x128xf32>
    %14 = arith.addf %11, %13 : vector<4x128xf32>
    %c0_12 = arith.constant 0 : index
    %c0_13 = arith.constant 0 : index
    %15 = vector.load %arg6[%c0_12, %c0_13] : memref<4x128xf32, #tpu.memory_space<vmem>>, vector<4x128xf32>
    tpu.vector_store %arg6[%c0_12, %c0_13], %14 {strides = array<i32>} : memref<4x128xf32, #tpu.memory_space<vmem>>, vector<4x128xf32>,
    return
  }
  func.func @transform_0(%arg0: i32) -> (i32, i32) {
    %c0_i32 = arith.constant 0 : i32
    %c0_i32_0 = arith.constant 0 : i32
    return %arg0, %c0_i32 : i32, i32
  }
  func.func @transform_1(%arg0: i32) -> (i32, i32) {
    %c0_i32 = arith.constant 0 : i32
    %c0_i32_0 = arith.constant 0 : i32
    %c0_i32_1 = arith.constant 0 : i32
    return %c0_i32, %c0_i32_0 : i32, i32
  }
  func.func @transform_2(%arg0: i32) -> (i32, i32) {
    %c0_i32 = arith.constant 0 : i32
    %c0_i32_0 = arith.constant 0 : i32
    %c0_i32_1 = arith.constant 0 : i32
    return %c0_i32, %c0_i32_0 : i32, i32
  }
  func.func @transform_3(%arg0: i32) -> (i32, i32) {
    %c0_i32 = arith.constant 0 : i32
    %c0_i32_0 = arith.constant 0 : i32
    %c0_i32_1 = arith.constant 0 : i32
    return %c0_i32, %c0_i32_0 : i32, i32
  }
  func.func @transform_4(%arg0: i32) -> (i32, i32) {
    %c0_i32 = arith.constant 0 : i32
    %c0_i32_0 = arith.constant 0 : i32
    %c0_i32_1 = arith.constant 0 : i32
    return %c0_i32, %c0_i32_0 : i32, i32
  }
  func.func @transform_5(%arg0: i32) -> (i32, i32) {
    %c0_i32 = arith.constant 0 : i32
    %c0_i32_0 = arith.constant 0 : i32
    return %arg0, %c0_i32 : i32, i32
  }
}

</mosaic_0001>

<bundles_post_ra>
// kernel: sc_model_forward.1
= control target key start
LH: loop header
LB: loop body
LE: loop exit
PB: predicated region body
PF: predicated region fallthrough
CT: control target
= control target key end

     0   :  { %s2479_s0 = inlined_call_operand.vmem [shape: f32[32,1664], index: 0, kind: input, shape index: {}]   ;;  %s2480_s1 = inlined_call_operand.vmem [shape: f32[1664,32], index: 1, kind: input, shape index: {}]   ;;  %s2481_s2 = inlined_call_operand.vmem [shape: f32[1,32], index: 2, kind: input, shape index: {}]   ;;  %s2482_s3 = inlined_call_operand.vmem [shape: f32[32,128], index: 3, kind: input, shape index: {}]   ;;  %s2483_s4 = inlined_call_operand.vmem [shape: f32[1,128], index: 4, kind: input, shape index: {}]   ;;  %s2484_s5 = inlined_call_operand.hbm [shape: f32[4,128], index: 5, kind: output, shape index: {}]  }
   0x1   :  { %v89_v0 = vld [vmem:[%s2480_s1 + $0x80] sm:$0xff]  ;;  %v90_v1 = vld [vmem:[%s2480_s1 + $0x88] sm:$0xff]  ;;  %v91_v11 = vld [vmem:[%s2480_s1 + $0x90] sm:$0xff] }
   0x2   :  { %v121_v2 = vld [vmem:[%s2480_s1 + $0x180] sm:$0xff]  ;;  %v1372_v3 = vpack.c.bf16 %v90_v1, %v89_v0  ;;  %v122_v4 = vld [vmem:[%s2480_s1 + $0x188] sm:$0xff]  ;;  %v92_v13 = vld [vmem:[%s2480_s1 + $0x98] sm:$0xff] }
   0x3   :  { %v73_v5 = vld [vmem:[%s2480_s1] sm:$0xff]  ;;  %v74_v6 = vld [vmem:[%s2480_s1 + $0x8] sm:$0xff]  ;;  %v1404_v7 = vpack.c.bf16 %v122_v4, %v121_v2  ;;  %v123_v14 = vld [vmem:[%s2480_s1 + $0x190] sm:$0xff]  ;;  %v1376_v16 = vpack.c.bf16 %v92_v13, %v91_v11 }
   0x4   :  { %v1374_v8 = vpack.c.bf16 %v74_v6, %v73_v5  ;;  %v105_v9 = vld [vmem:[%s2480_s1 + $0x100] sm:$0xff]  ;;  %v106_v10 = vld [vmem:[%s2480_s1 + $0x108] sm:$0xff]  ;;  %1373 = vmatprep.subr.bf16.mxu0 %v1372_v3  ;;  %v124_v15 = vld [vmem:[%s2480_s1 + $0x198] sm:$0xff] }
   0x5   :  { %v1406_v12 = vpack.c.bf16 %v106_v10, %v105_v9  ;;  %1405 = vmatprep.subr.bf16.mxu1 %v1404_v7  ;;  %v1408_v17 = vpack.c.bf16 %v124_v15, %v123_v14  ;;  %v75_v18 = vld [vmem:[%s2480_s1 + $0x10] sm:$0xff]  ;;  %v76_v19 = vld [vmem:[%s2480_s1 + $0x18] sm:$0xff]  ;;  %v93_v23 = vld [vmem:[%s2480_s1 + $0xa0] sm:$0xff] }
   0x6   :  { %1375 = vmatpush3.bf16.msra.mxu0 %v1374_v8  ;;  %v107_v20 = vld [vmem:[%s2480_s1 + $0x110] sm:$0xff]  ;;  %v1378_v21 = vpack.c.bf16 %v76_v19, %v75_v18  ;;  %v108_v22 = vld [vmem:[%s2480_s1 + $0x118] sm:$0xff]  ;;  %v94_v24 = vld [vmem:[%s2480_s1 + $0xa8] sm:$0xff] }
   0x7   :  { %1407 = vmatpush3.bf16.msra.mxu1 %v1406_v12  ;;  %1377 = vmatprep.subr.bf16.mxu0 %v1376_v16  ;;  %v1410_v25 = vpack.c.bf16 %v108_v22, %v107_v20  ;;  %v1380_v26 = vpack.c.bf16 %v94_v24, %v93_v23  ;;  %v125_v27 = vld [vmem:[%s2480_s1 + $0x1a0] sm:$0xff]  ;;  %v126_v28 = vld [vmem:[%s2480_s1 + $0x1a8] sm:$0xff]  ;;  %v95_v35 = vld [vmem:[%s2480_s1 + $0xb0] sm:$0xff] }
   0x8   :  { %1409 = vmatprep.subr.bf16.mxu1 %v1408_v17  ;;  %v77_v29 = vld [vmem:[%s2480_s1 + $0x20] sm:$0xff]  ;;  %v1412_v30 = vpack.c.bf16 %v126_v28, %v125_v27  ;;  %v78_v31 = vld [vmem:[%s2480_s1 + $0x28] sm:$0xff]  ;;  %v96_v36 = vld [vmem:[%s2480_s1 + $0xb8] sm:$0xff] }
   0x9   :  { %v109_v32 = vld [vmem:[%s2480_s1 + $0x120] sm:$0xff]  ;;  %v110_v33 = vld [vmem:[%s2480_s1 + $0x128] sm:$0xff]  ;;  %v1382_v34 = vpack.c.bf16 %v78_v31, %v77_v29  ;;  %v127_v37 = vld [vmem:[%s2480_s1 + $0x1b0] sm:$0xff]  ;;  %v1384_v39 = vpack.c.bf16 %v96_v36, %v95_v35 }
   0xa   :  { %1379 = vmatpush3.bf16.msra.mxu0 %v1378_v21  ;;  %v1414_v38 = vpack.c.bf16 %v110_v33, %v109_v32  ;;  %v128_v40 = vld [vmem:[%s2480_s1 + $0x1b8] sm:$0xff]  ;;  %v79_v41 = vld [vmem:[%s2480_s1 + $0x30] sm:$0xff]  ;;  %v97_v46 = vld [vmem:[%s2480_s1 + $0xc0] sm:$0xff] }
   0xb   :  { %1411 = vmatpush3.bf16.msra.mxu1 %v1410_v25  ;;  %1381 = vmatprep.subr.bf16.mxu0 %v1380_v26  ;;  %v80_v42 = vld [vmem:[%s2480_s1 + $0x38] sm:$0xff]  ;;  %v1416_v43 = vpack.c.bf16 %v128_v40, %v127_v37  ;;  %v111_v44 = vld [vmem:[%s2480_s1 + $0x130] sm:$0xff]  ;;  %v98_v47 = vld [vmem:[%s2480_s1 + $0xc8] sm:$0xff] }
   0xc   :  { %1413 = vmatprep.subr.bf16.mxu1 %v1412_v30  ;;  %v112_v45 = vld [vmem:[%s2480_s1 + $0x138] sm:$0xff]  ;;  %v129_v48 = vld [vmem:[%s2480_s1 + $0x1c0] sm:$0xff]  ;;  %v130_v49 = vld [vmem:[%s2480_s1 + $0x1c8] sm:$0xff]  ;;  %v1386_v50 = vpack.c.bf16 %v80_v42, %v79_v41  ;;  %v1388_v52 = vpack.c.bf16 %v98_v47, %v97_v46 }
   0xd   :  { %v1418_v51 = vpack.c.bf16 %v112_v45, %v111_v44  ;;  %v81_v53 = vld [vmem:[%s2480_s1 + $0x40] sm:$0xff]  ;;  %v82_v54 = vld [vmem:[%s2480_s1 + $0x48] sm:$0xff]  ;;  %v1420_v56 = vpack.c.bf16 %v130_v49, %v129_v48  ;;  %v99_v58 = vld [vmem:[%s2480_s1 + $0xd0] sm:$0xff] }
   0xe   :  { %1383 = vmatpush3.bf16.msra.mxu0 %v1382_v34  ;;  %v113_v55 = vld [vmem:[%s2480_s1 + $0x140] sm:$0xff]  ;;  %v114_v57 = vld [vmem:[%s2480_s1 + $0x148] sm:$0xff]  ;;  %v100_v59 = vld [vmem:[%s2480_s1 + $0xd8] sm:$0xff]  ;;  %v1390_v62 = vpack.c.bf16 %v82_v54, %v81_v53 }
   0xf   :  { %1415 = vmatpush3.bf16.msra.mxu1 %v1414_v38  ;;  %1385 = vmatprep.subr.bf16.mxu0 %v1384_v39  ;;  %v131_v60 = vld [vmem:[%s2480_s1 + $0x1d0] sm:$0xff]  ;;  %v132_v61 = vld [vmem:[%s2480_s1 + $0x1d8] sm:$0xff]  ;;  %v1422_v63 = vpack.c.bf16 %v114_v57, %v113_v55  ;;  %v1392_v0 = vpack.c.bf16 %v100_v59, %v99_v58  ;;  %v101_v6 = vld [vmem:[%s2480_s1 + $0xe0] sm:$0xff] }
  0x10   :  { %1417 = vmatprep.subr.bf16.mxu1 %v1416_v43  ;;  %v83_v1 = vld [vmem:[%s2480_s1 + $0x50] sm:$0xff]  ;;  %v84_v2 = vld [vmem:[%s2480_s1 + $0x58] sm:$0xff]  ;;  %v1424_v4 = vpack.c.bf16 %v132_v61, %v131_v60  ;;  %v102_v7 = vld [vmem:[%s2480_s1 + $0xe8] sm:$0xff] }
  0x11   :  { %v115_v3 = vld [vmem:[%s2480_s1 + $0x150] sm:$0xff]  ;;  %v116_v5 = vld [vmem:[%s2480_s1 + $0x158] sm:$0xff]  ;;  %v133_v8 = vld [vmem:[%s2480_s1 + $0x1e0] sm:$0xff]  ;;  %v1394_v10 = vpack.c.bf16 %v84_v2, %v83_v1  ;;  %v1396_v14 = vpack.c.bf16 %v102_v7, %v101_v6 }
  0x12   :  { %1387 = vmatpush3.bf16.msra.mxu0 %v1386_v50  ;;  %v134_v9 = vld [vmem:[%s2480_s1 + $0x1e8] sm:$0xff]  ;;  %v85_v11 = vld [vmem:[%s2480_s1 + $0x60] sm:$0xff]  ;;  %v1426_v13 = vpack.c.bf16 %v116_v5, %v115_v3  ;;  %v24_v17 = vld [vmem:[%s2479_s0 + $0x18] sm:$0xff] }
  0x13   :  { %1419 = vmatpush3.bf16.msra.mxu1 %v1418_v51  ;;  %1389 = vmatprep.subr.bf16.mxu0 %v1388_v52  ;;  %v86_v12 = vld [vmem:[%s2480_s1 + $0x68] sm:$0xff]  ;;  %v117_v15 = vld [vmem:[%s2480_s1 + $0x160] sm:$0xff]  ;;  %v1428_v18 = vpack.c.bf16 %v134_v9, %v133_v8  ;;  %v103_v20 = vld [vmem:[%s2480_s1 + $0xf0] sm:$0xff] }
  0x14   :  { %1421 = vmatprep.subr.bf16.mxu1 %v1420_v56  ;;  %v22_v16 = vld [vmem:[%s2479_s0 + $0x8] sm:$0xff]  ;;  %v104_v21 = vld [vmem:[%s2480_s1 + $0xf8] sm:$0xff]  ;;  %v135_v22 = vld [vmem:[%s2480_s1 + $0x1f0] sm:$0xff]  ;;  %430 = vmatprep.mubr.f32.mxu1 %v24_v17  ;;  %v1398_v24 = vpack.c.bf16 %v86_v12, %v85_v11 }
  0x15   :  { %v118_v19 = vld [vmem:[%s2480_s1 + $0x168] sm:$0xff]  ;;  %345 = vmatprep.mubr.f32.mxu0 %v22_v16  ;;  %v136_v23 = vld [vmem:[%s2480_s1 + $0x1f8] sm:$0xff]  ;;  %v1400_v26 = vpack.c.bf16 %v104_v21, %v103_v20  ;;  %v87_v27 = vld [vmem:[%s2480_s1 + $0x70] sm:$0xff] }
  0x16   :  { %1391 = vmatpush3.bf16.msra.mxu0 %v1390_v62  ;;  %v1430_v25 = vpack.c.bf16 %v118_v19, %v117_v15  ;;  %v88_v28 = vld [vmem:[%s2480_s1 + $0x78] sm:$0xff]  ;;  %v119_v29 = vld [vmem:[%s2480_s1 + $0x170] sm:$0xff]  ;;  %v1432_v30 = vpack.c.bf16 %v136_v23, %v135_v22  ;;  %v153_v32 = vld [vmem:[%s2480_s1 + $0x280] sm:$0xff] }
  0x17   :  { %1423 = vmatpush3.bf16.msra.mxu1 %v1422_v63  ;;  %1393 = vmatprep.subr.bf16.mxu0 %v1392_v0  ;;  %v120_v31 = vld [vmem:[%s2480_s1 + $0x178] sm:$0xff]  ;;  %v154_v33 = vld [vmem:[%s2480_s1 + $0x288] sm:$0xff]  ;;  %v185_v34 = vld [vmem:[%s2480_s1 + $0x380] sm:$0xff]  ;;  %v1402_v36 = vpack.c.bf16 %v88_v28, %v87_v27 }
  0x18   :  { %1425 = vmatprep.subr.bf16.mxu1 %v1424_v4  ;;  %v186_v35 = vld [vmem:[%s2480_s1 + $0x388] sm:$0xff]  ;;  %v1434_v37 = vpack.c.bf16 %v120_v31, %v119_v29  ;;  %v1436_v38 = vpack.c.bf16 %v154_v33, %v153_v32  ;;  %v137_v39 = vld [vmem:[%s2480_s1 + $0x200] sm:$0xff]  ;;  %v155_v44 = vld [vmem:[%s2480_s1 + $0x290] sm:$0xff] }
  0x19   :  { %v138_v40 = vld [vmem:[%s2480_s1 + $0x208] sm:$0xff]  ;;  %v169_v41 = vld [vmem:[%s2480_s1 + $0x300] sm:$0xff]  ;;  %v1468_v42 = vpack.c.bf16 %v186_v35, %v185_v34  ;;  %v156_v45 = vld [vmem:[%s2480_s1 + $0x298] sm:$0xff] }
  0x1a   :  { %1395 = vmatpush3.bf16.msra.mxu0 %v1394_v10  ;;  %v170_v43 = vld [vmem:[%s2480_s1 + $0x308] sm:$0xff]  ;;  %v187_v46 = vld [vmem:[%s2480_s1 + $0x390] sm:$0xff]  ;;  %v188_v47 = vld [vmem:[%s2480_s1 + $0x398] sm:$0xff]  ;;  %v1438_v50 = vpack.c.bf16 %v138_v40, %v137_v39  ;;  %v1440_v52 = vpack.c.bf16 %v156_v45, %v155_v44 }
  0x1b   :  { %1427 = vmatpush3.bf16.msra.mxu1 %v1426_v13  ;;  %1397 = vmatprep.subr.bf16.mxu0 %v1396_v14  ;;  %v21_v48 = vld [vmem:[%s2479_s0] sm:$0xff]  ;;  %v23_v49 = vld [vmem:[%s2479_s0 + $0x10] sm:$0xff]  ;;  %v1470_v51 = vpack.c.bf16 %v170_v43, %v169_v41  ;;  %v140_v54 = vld [vmem:[%s2480_s1 + $0x218] sm:$0xff]  ;;  %v1472_v56 = vpack.c.bf16 %v188_v47, %v187_v46 }
  0x1c   :  { %1429 = vmatprep.subr.bf16.mxu1 %v1428_v18  ;;  %v139_v53 = vld [vmem:[%s2480_s1 + $0x210] sm:$0xff]  ;;  %v172_v57 = vld [vmem:[%s2480_s1 + $0x318] sm:$0xff]  ;;  %v157_v58 = vld [vmem:[%s2480_s1 + $0x2a0] sm:$0xff] }
  0x1d   :  { %v171_v55 = vld [vmem:[%s2480_s1 + $0x310] sm:$0xff]  ;;  %v158_v59 = vld [vmem:[%s2480_s1 + $0x2a8] sm:$0xff]  ;;  %v189_v60 = vld [vmem:[%s2480_s1 + $0x3a0] sm:$0xff]  ;;  %v1442_v63 = vpack.c.bf16 %v140_v54, %v139_v53 }
  0x1e   :  { %1399 = vmatpush3.bf16.msra.mxu0 %v1398_v24  ;;  %v190_v61 = vld [vmem:[%s2480_s1 + $0x3a8] sm:$0xff]  ;;  %v35_v62 = vld [vmem:[%s2479_s0 + $0x70] sm:$0xff]  ;;  %v141_v0 = vld [vmem:[%s2480_s1 + $0x220] sm:$0xff]  ;;  %v1474_v3 = vpack.c.bf16 %v172_v57, %v171_v55  ;;  %v1444_v4 = vpack.c.bf16 %v158_v59, %v157_v58 }
  0x1f   :  { %1431 = vmatpush3.bf16.msra.mxu1 %v1430_v25  ;;  %1401 = vmatprep.subr.bf16.mxu0 %v1400_v26  ;;  %v37_v1 = vld [vmem:[%s2479_s0 + $0x80] sm:$0xff]  ;;  %v34_v2 = vld [vmem:[%s2479_s0 + $0x68] sm:$0xff]  ;;  %v36_v7 = vld [vmem:[%s2479_s0 + $0x78] sm:$0xff]  ;;  %v1476_v8 = vpack.c.bf16 %v190_v61, %v189_v60 }
  0x20   :  { %1433 = vmatprep.subr.bf16.mxu1 %v1432_v30  ;;  %v142_v5 = vld [vmem:[%s2480_s1 + $0x228] sm:$0xff]  ;;  %v173_v6 = vld [vmem:[%s2480_s1 + $0x320] sm:$0xff]  ;;  %v159_v10 = vld [vmem:[%s2480_s1 + $0x2b0] sm:$0xff] }
  0x21   :  { %v174_v9 = vld [vmem:[%s2480_s1 + $0x328] sm:$0xff]  ;;  %v160_v11 = vld [vmem:[%s2480_s1 + $0x2b8] sm:$0xff]  ;;  %v191_v12 = vld [vmem:[%s2480_s1 + $0x3b0] sm:$0xff]  ;;  %v1446_v15 = vpack.c.bf16 %v142_v5, %v141_v0 }
  0x22   :  { %1403 = vmatpush3.bf16.msra.mxu0 %v1402_v36  ;;  %v192_v13 = vld [vmem:[%s2480_s1 + $0x3b8] sm:$0xff]  ;;  %v143_v16 = vld [vmem:[%s2480_s1 + $0x230] sm:$0xff]  ;;  %v50_v17 = vld [vmem:[%s2479_s0 + $0xe8] sm:$0xff]  ;;  %v1478_v19 = vpack.c.bf16 %v174_v9, %v173_v6  ;;  %v1448_v20 = vpack.c.bf16 %v160_v11, %v159_v10 }
  0x23   :  { %1435 = vmatpush3.bf16.msra.mxu1 %v1434_v37  ;;  %1437 = vmatprep.subr.bf16.mxu0 %v1436_v38  ;;  %v48_v14 = vld [vmem:[%s2479_s0 + $0xd8] sm:$0xff]  ;;  %v47_v18 = vld [vmem:[%s2479_s0 + $0xd0] sm:$0xff]  ;;  %v49_v23 = vld [vmem:[%s2479_s0 + $0xe0] sm:$0xff]  ;;  %v1480_v24 = vpack.c.bf16 %v192_v13, %v191_v12 }
  0x24   :  { %1469 = vmatprep.subr.bf16.mxu1 %v1468_v42  ;;  %v144_v21 = vld [vmem:[%s2480_s1 + $0x238] sm:$0xff]  ;;  %v175_v22 = vld [vmem:[%s2480_s1 + $0x330] sm:$0xff]  ;;  %v161_v26 = vld [vmem:[%s2480_s1 + $0x2c0] sm:$0xff] }
  0x25   :  { %346 = vmatmul.mubr.f32.vlgmr.msra.gmra.mrb[0].mxu0 %v21_v48  ;;  %v176_v25 = vld [vmem:[%s2480_s1 + $0x338] sm:$0xff]  ;;  %v162_v27 = vld [vmem:[%s2480_s1 + $0x2c8] sm:$0xff]  ;;  %v193_v28 = vld [vmem:[%s2480_s1 + $0x3c0] sm:$0xff]  ;;  %v1450_v31 = vpack.c.bf16 %v144_v21, %v143_v16 }
  0x26   :  { %431 = vmatmul.mubr.f32.vlgmr.msra.gmra.mrb[0].mxu1 %v23_v49  ;;  %1439 = vmatpush3.bf16.msra.mxu0 %v1438_v50  ;;  %v194_v29 = vld [vmem:[%s2480_s1 + $0x3c8] sm:$0xff]  ;;  %v61_v30 = vld [vmem:[%s2479_s0 + $0x140] sm:$0xff]  ;;  %v63_v33 = vld [vmem:[%s2479_s0 + $0x150] sm:$0xff]  ;;  %v1482_v35 = vpack.c.bf16 %v176_v25, %v175_v22  ;;  %v1452_v36 = vpack.c.bf16 %v162_v27, %v161_v26 }
  0x27   :  { %1471 = vmatpush3.bf16.msra.mxu1 %v1470_v51  ;;  %1441 = vmatprep.subr.bf16.mxu0 %v1440_v52  ;;  %v145_v32 = vld [vmem:[%s2480_s1 + $0x240] sm:$0xff]  ;;  %v60_v34 = vld [vmem:[%s2479_s0 + $0x138] sm:$0xff]  ;;  %v146_v37 = vld [vmem:[%s2480_s1 + $0x248] sm:$0xff]  ;;  %v1484_v40 = vpack.c.bf16 %v194_v29, %v193_v28 }
  0x28   :  { %1473 = vmatprep.subr.bf16.mxu1 %v1472_v56  ;;  %350 = vmatprep.mubr.f32.mxu0 %v35_v62  ;;  %v177_v38 = vld [vmem:[%s2480_s1 + $0x340] sm:$0xff]  ;;  %v62_v39 = vld [vmem:[%s2479_s0 + $0x148] sm:$0xff]  ;;  %v163_v42 = vld [vmem:[%s2480_s1 + $0x2d0] sm:$0xff]  ;;  %v1454_v47 = vpack.c.bf16 %v146_v37, %v145_v32 }
  0x29   :  { %435 = vmatprep.mubr.f32.mxu1 %v37_v1  ;;  %351 = vmatmul.mubr.f32.gmra.mrb[2].mxu0 %v34_v2  ;;  %v178_v41 = vld [vmem:[%s2480_s1 + $0x348] sm:$0xff]  ;;  %v164_v43 = vld [vmem:[%s2480_s1 + $0x2d8] sm:$0xff]  ;;  %v195_v44 = vld [vmem:[%s2480_s1 + $0x3d0] sm:$0xff] }
  0x2a   :  { %1443 = vmatpush3.bf16.msra.mxu0 %v1442_v63  ;;  %436 = vmatmul.mubr.f32.gmra.mrb[2].mxu1 %v36_v7  ;;  %v196_v45 = vld [vmem:[%s2480_s1 + $0x3d8] sm:$0xff]  ;;  %v26_v46 = vld [vmem:[%s2479_s0 + $0x28] sm:$0xff]  ;;  %v147_v48 = vld [vmem:[%s2480_s1 + $0x250] sm:$0xff]  ;;  %v1486_v49 = vpack.c.bf16 %v178_v41, %v177_v38  ;;  %v1456_v50 = vpack.c.bf16 %v164_v43, %v163_v42 }
  0x2b   :  { %1475 = vmatpush3.bf16.msra.mxu1 %v1474_v3  ;;  %1445 = vmatprep.subr.bf16.mxu0 %v1444_v4  ;;  %v148_v51 = vld [vmem:[%s2480_s1 + $0x258] sm:$0xff]  ;;  %v179_v52 = vld [vmem:[%s2480_s1 + $0x350] sm:$0xff]  ;;  %v1488_v54 = vpack.c.bf16 %v196_v45, %v195_v44  ;;  %v165_v56 = vld [vmem:[%s2480_s1 + $0x2e0] sm:$0xff] }
  0x2c   :  { %1477 = vmatprep.subr.bf16.mxu1 %v1476_v8  ;;  %355 = vmatprep.mubr.f32.mxu0 %v48_v14  ;;  %v28_v53 = vld [vmem:[%s2479_s0 + $0x38] sm:$0xff]  ;;  %v166_v57 = vld [vmem:[%s2480_s1 + $0x2e8] sm:$0xff]  ;;  %v197_v58 = vld [vmem:[%s2480_s1 + $0x3e0] sm:$0xff]  ;;  %v1458_v60 = vpack.c.bf16 %v148_v51, %v147_v48 }
  0x2d   :  { %440 = vmatprep.mubr.f32.mxu1 %v50_v17  ;;  %356 = vmatmul.mubr.f32.gmra.mrb[4].mxu0 %v47_v18  ;;  %v180_v55 = vld [vmem:[%s2480_s1 + $0x358] sm:$0xff]  ;;  %v198_v59 = vld [vmem:[%s2480_s1 + $0x3e8] sm:$0xff]  ;;  %v1460_v62 = vpack.c.bf16 %v166_v57, %v165_v56  ;;  %v149_v63 = vld [vmem:[%s2480_s1 + $0x260] sm:$0xff] }
  0x2e   :  { %1447 = vmatpush3.bf16.msra.mxu0 %v1446_v15  ;;  %441 = vmatmul.mubr.f32.gmra.mrb[4].mxu1 %v49_v23  ;;  %v1490_v61 = vpack.c.bf16 %v180_v55, %v179_v52  ;;  %v150_v0 = vld [vmem:[%s2480_s1 + $0x268] sm:$0xff]  ;;  %v181_v1 = vld [vmem:[%s2480_s1 + $0x360] sm:$0xff]  ;;  %v1492_v2 = vpack.c.bf16 %v198_v59, %v197_v58  ;;  %v167_v4 = vld [vmem:[%s2480_s1 + $0x2f0] sm:$0xff] }
  0x2f   :  { %1479 = vmatpush3.bf16.msra.mxu1 %v1478_v19  ;;  %1449 = vmatprep.subr.bf16.mxu0 %v1448_v20  ;;  %v182_v3 = vld [vmem:[%s2480_s1 + $0x368] sm:$0xff]  ;;  %v168_v5 = vld [vmem:[%s2480_s1 + $0x2f8] sm:$0xff]  ;;  %v199_v6 = vld [vmem:[%s2480_s1 + $0x3f0] sm:$0xff]  ;;  %v1462_v8 = vpack.c.bf16 %v150_v0, %v149_v63 }
  0x30   :  { %1481 = vmatprep.subr.bf16.mxu1 %v1480_v24  ;;  %360 = vmatprep.mubr.f32.mxu0 %v61_v30  ;;  %v200_v7 = vld [vmem:[%s2480_s1 + $0x3f8] sm:$0xff]  ;;  %v1494_v9 = vpack.c.bf16 %v182_v3, %v181_v1  ;;  %v1464_v10 = vpack.c.bf16 %v168_v5, %v167_v4  ;;  %v151_v11 = vld [vmem:[%s2480_s1 + $0x270] sm:$0xff]  ;;  %v217_v16 = vld [vmem:[%s2480_s1 + $0x480] sm:$0xff] }
  0x31   :  { %445 = vmatprep.mubr.f32.mxu1 %v63_v33  ;;  %361 = vmatmul.mubr.f32.gmra.mrb[6].mxu0 %v60_v34  ;;  %v152_v12 = vld [vmem:[%s2480_s1 + $0x278] sm:$0xff]  ;;  %v183_v13 = vld [vmem:[%s2480_s1 + $0x370] sm:$0xff]  ;;  %v1496_v14 = vpack.c.bf16 %v200_v7, %v199_v6  ;;  %v218_v17 = vld [vmem:[%s2480_s1 + $0x488] sm:$0xff] }
  0x32   :  { %1451 = vmatpush3.bf16.msra.mxu0 %v1450_v31  ;;  %446 = vmatmul.mubr.f32.gmra.mrb[6].mxu1 %v62_v39  ;;  %v184_v15 = vld [vmem:[%s2480_s1 + $0x378] sm:$0xff]  ;;  %v249_v18 = vld [vmem:[%s2480_s1 + $0x580] sm:$0xff]  ;;  %v250_v19 = vld [vmem:[%s2480_s1 + $0x588] sm:$0xff]  ;;  %v1466_v20 = vpack.c.bf16 %v152_v12, %v151_v11  ;;  %v1500_v22 = vpack.c.bf16 %v218_v17, %v217_v16 }
  0x33   :  { %1483 = vmatpush3.bf16.msra.mxu1 %v1482_v35  ;;  %1453 = vmatprep.subr.bf16.mxu0 %v1452_v36  ;;  %v1498_v21 = vpack.c.bf16 %v184_v15, %v183_v13  ;;  %v201_v23 = vld [vmem:[%s2480_s1 + $0x400] sm:$0xff]  ;;  %v202_v24 = vld [vmem:[%s2480_s1 + $0x408] sm:$0xff]  ;;  %v1532_v25 = vpack.c.bf16 %v250_v19, %v249_v18  ;;  %v219_v29 = vld [vmem:[%s2480_s1 + $0x490] sm:$0xff] }
  0x34   :  { %1485 = vmatprep.subr.bf16.mxu1 %v1484_v40  ;;  %515 = vmatprep.mubr.f32.mxu0 %v26_v46  ;;  %v233_v26 = vld [vmem:[%s2480_s1 + $0x500] sm:$0xff]  ;;  %v234_v27 = vld [vmem:[%s2480_s1 + $0x508] sm:$0xff]  ;;  %v220_v30 = vld [vmem:[%s2480_s1 + $0x498] sm:$0xff]  ;;  %v1502_v31 = vpack.c.bf16 %v202_v24, %v201_v23 }
  0x35   :  { %600 = vmatprep.mubr.f32.mxu1 %v28_v53  ;;  %v25_v28 = vld [vmem:[%s2479_s0 + $0x20] sm:$0xff]  ;;  %v27_v32 = vld [vmem:[%s2479_s0 + $0x30] sm:$0xff]  ;;  %v252_v34 = vld [vmem:[%s2480_s1 + $0x598] sm:$0xff]  ;;  %v1534_v36 = vpack.c.bf16 %v234_v27, %v233_v26  ;;  %v1504_v40 = vpack.c.bf16 %v220_v30, %v219_v29 }
  0x36   :  { %1455 = vmatpush3.bf16.msra.mxu0 %v1454_v47  ;;  %v251_v33 = vld [vmem:[%s2480_s1 + $0x590] sm:$0xff]  ;;  %v204_v38 = vld [vmem:[%s2480_s1 + $0x418] sm:$0xff]  ;;  %v38_v39 = vld [vmem:[%s2479_s0 + $0x88] sm:$0xff] }
  0x37   :  { %1487 = vmatpush3.bf16.msra.mxu1 %v1486_v49  ;;  %1457 = vmatprep.subr.bf16.mxu0 %v1456_v50  ;;  %v39_v35 = vld [vmem:[%s2479_s0 + $0x90] sm:$0xff]  ;;  %v236_v42 = vld [vmem:[%s2480_s1 + $0x518] sm:$0xff]  ;;  %v41_v43 = vld [vmem:[%s2479_s0 + $0xa0] sm:$0xff]  ;;  %v1536_v44 = vpack.c.bf16 %v252_v34, %v251_v33 }
  0x38   :  { %1489 = vmatprep.subr.bf16.mxu1 %v1488_v54  ;;  %v203_v37 = vld [vmem:[%s2480_s1 + $0x410] sm:$0xff]  ;;  %v221_v45 = vld [vmem:[%s2480_s1 + $0x4a0] sm:$0xff]  ;;  %v222_v46 = vld [vmem:[%s2480_s1 + $0x4a8] sm:$0xff] }
  0x39   :  { %v235_v41 = vld [vmem:[%s2480_s1 + $0x510] sm:$0xff]  ;;  %v1506_v47 = vpack.c.bf16 %v204_v38, %v203_v37  ;;  %v40_v48 = vld [vmem:[%s2479_s0 + $0x98] sm:$0xff]  ;;  %v253_v49 = vld [vmem:[%s2480_s1 + $0x5a0] sm:$0xff]  ;;  %v1508_v56 = vpack.c.bf16 %v222_v46, %v221_v45 }
  0x3a   :  { %1459 = vmatpush3.bf16.msra.mxu0 %v1458_v60  ;;  %v254_v50 = vld [vmem:[%s2480_s1 + $0x5a8] sm:$0xff]  ;;  %v52_v51 = vld [vmem:[%s2479_s0 + $0xf8] sm:$0xff]  ;;  %v1538_v52 = vpack.c.bf16 %v236_v42, %v235_v41  ;;  %v205_v53 = vld [vmem:[%s2480_s1 + $0x420] sm:$0xff] }
  0x3b   :  { %1491 = vmatpush3.bf16.msra.mxu1 %v1490_v61  ;;  %1461 = vmatprep.subr.bf16.mxu0 %v1460_v62  ;;  %v206_v54 = vld [vmem:[%s2480_s1 + $0x428] sm:$0xff]  ;;  %v51_v55 = vld [vmem:[%s2479_s0 + $0xf0] sm:$0xff]  ;;  %v237_v58 = vld [vmem:[%s2480_s1 + $0x520] sm:$0xff]  ;;  %v1540_v61 = vpack.c.bf16 %v254_v50, %v253_v49 }
  0x3c   :  { %1493 = vmatprep.subr.bf16.mxu1 %v1492_v2  ;;  %v54_v57 = vld [vmem:[%s2479_s0 + $0x108] sm:$0xff]  ;;  %v53_v60 = vld [vmem:[%s2479_s0 + $0x100] sm:$0xff]  ;;  %v223_v62 = vld [vmem:[%s2480_s1 + $0x4b0] sm:$0xff]  ;;  %v1510_v0 = vpack.c.bf16 %v206_v54, %v205_v53 }
  0x3d   :  { %v238_v59 = vld [vmem:[%s2480_s1 + $0x528] sm:$0xff]  ;;  %v224_v63 = vld [vmem:[%s2480_s1 + $0x4b8] sm:$0xff]  ;;  %v65_v1 = vld [vmem:[%s2479_s0 + $0x160] sm:$0xff] }
  0x3e   :  { %1463 = vmatpush3.bf16.msra.mxu0 %v1462_v8  ;;  %v255_v2 = vld [vmem:[%s2480_s1 + $0x5b0] sm:$0xff]  ;;  %v256_v3 = vld [vmem:[%s2480_s1 + $0x5b8] sm:$0xff]  ;;  %v1542_v4 = vpack.c.bf16 %v238_v59, %v237_v58  ;;  %v1512_v8 = vpack.c.bf16 %v224_v63, %v223_v62  ;;  %v226_v11 = vld [vmem:[%s2480_s1 + $0x4c8] sm:$0xff] }
  0x3f   :  { %1495 = vmatpush3.bf16.msra.mxu1 %v1494_v9  ;;  %1465 = vmatprep.subr.bf16.mxu0 %v1464_v10  ;;  %v207_v5 = vld [vmem:[%s2480_s1 + $0x430] sm:$0xff]  ;;  %v208_v6 = vld [vmem:[%s2480_s1 + $0x438] sm:$0xff]  ;;  %v225_v10 = vld [vmem:[%s2480_s1 + $0x4c0] sm:$0xff]  ;;  %v1544_v13 = vpack.c.bf16 %v256_v3, %v255_v2 }
  0x40   :  { %1497 = vmatprep.subr.bf16.mxu1 %v1496_v14  ;;  %v239_v7 = vld [vmem:[%s2480_s1 + $0x530] sm:$0xff]  ;;  %v240_v9 = vld [vmem:[%s2480_s1 + $0x538] sm:$0xff]  ;;  %v257_v14 = vld [vmem:[%s2480_s1 + $0x5c0] sm:$0xff]  ;;  %v1514_v17 = vpack.c.bf16 %v208_v6, %v207_v5 }
  0x41   :  { %v67_v12 = vld [vmem:[%s2479_s0 + $0x170] sm:$0xff]  ;;  %v258_v15 = vld [vmem:[%s2480_s1 + $0x5c8] sm:$0xff]  ;;  %v64_v16 = vld [vmem:[%s2479_s0 + $0x158] sm:$0xff]  ;;  %v1546_v19 = vpack.c.bf16 %v240_v9, %v239_v7 }
  0x42   :  { %1467 = vmatpush3.bf16.msra.mxu0 %v1466_v20  ;;  %v66_v18 = vld [vmem:[%s2479_s0 + $0x168] sm:$0xff]  ;;  %v1516_v20 = vpack.c.bf16 %v226_v11, %v225_v10  ;;  %v241_v23 = vld [vmem:[%s2480_s1 + $0x540] sm:$0xff]  ;;  %v1548_v24 = vpack.c.bf16 %v258_v15, %v257_v14  ;;  %v227_v26 = vld [vmem:[%s2480_s1 + $0x4d0] sm:$0xff] }
  0x43   :  { %1499 = vmatpush3.bf16.msra.mxu1 %v1498_v21  ;;  %1501 = vmatprep.subr.bf16.mxu0 %v1500_v22  ;;  %v209_v21 = vld [vmem:[%s2480_s1 + $0x440] sm:$0xff]  ;;  %v210_v22 = vld [vmem:[%s2480_s1 + $0x448] sm:$0xff]  ;;  %v228_v27 = vld [vmem:[%s2480_s1 + $0x4d8] sm:$0xff] }
  0x44   :  { %1533 = vmatprep.subr.bf16.mxu1 %v1532_v25  ;;  %v242_v25 = vld [vmem:[%s2480_s1 + $0x548] sm:$0xff]  ;;  %v260_v29 = vld [vmem:[%s2480_s1 + $0x5d8] sm:$0xff]  ;;  %v1520_v34 = vpack.c.bf16 %v228_v27, %v227_v26  ;;  %v243_v37 = vld [vmem:[%s2480_s1 + $0x550] sm:$0xff] }
  0x45   :  { %516 = vmatmul.mubr.f32.vlgmr.msra.gmra.mrb[8].mxu0 %v25_v28  ;;  %v259_v28 = vld [vmem:[%s2480_s1 + $0x5d0] sm:$0xff]  ;;  %v30_v30 = vld [vmem:[%s2479_s0 + $0x48] sm:$0xff]  ;;  %v1550_v33 = vpack.c.bf16 %v242_v25, %v241_v23  ;;  %v261_v42 = vld [vmem:[%s2480_s1 + $0x5e0] sm:$0xff] }
  0x46   :  { %1503 = vmatpush3.bf16.msra.mxu0 %v1502_v31  ;;  %601 = vmatmul.mubr.f32.vlgmr.msra.gmra.mrb[8].mxu1 %v27_v32  ;;  %v1518_v31 = vpack.c.bf16 %v210_v22, %v209_v21  ;;  %v32_v32 = vld [vmem:[%s2479_s0 + $0x58] sm:$0xff]  ;;  %v1552_v38 = vpack.c.bf16 %v260_v29, %v259_v28  ;;  %v230_v41 = vld [vmem:[%s2480_s1 + $0x4e8] sm:$0xff]  ;;  %v213_v45 = vld [vmem:[%s2480_s1 + $0x460] sm:$0xff] }
  0x47   :  { %520 = vmatprep.mubr.f32.mxu0 %v39_v35  ;;  %1535 = vmatpush3.bf16.msra.mxu1 %v1534_v36  ;;  %v211_v35 = vld [vmem:[%s2480_s1 + $0x450] sm:$0xff]  ;;  %v212_v36 = vld [vmem:[%s2480_s1 + $0x458] sm:$0xff]  ;;  %v245_v49 = vld [vmem:[%s2480_s1 + $0x560] sm:$0xff] }
  0x48   :  { %1505 = vmatprep.subr.bf16.mxu0 %v1504_v40  ;;  %605 = vmatprep.mubr.f32.mxu1 %v41_v43  ;;  %v229_v40 = vld [vmem:[%s2480_s1 + $0x4e0] sm:$0xff]  ;;  %v262_v43 = vld [vmem:[%s2480_s1 + $0x5e8] sm:$0xff]  ;;  %v232_v53 = vld [vmem:[%s2480_s1 + $0x4f8] sm:$0xff] }
  0x49   :  { %521 = vmatmul.mubr.f32.gmra.mrb[10].mxu0 %v38_v39  ;;  %1537 = vmatprep.subr.bf16.mxu1 %v1536_v44  ;;  %v244_v39 = vld [vmem:[%s2480_s1 + $0x558] sm:$0xff]  ;;  %v1522_v44 = vpack.c.bf16 %v212_v36, %v211_v35  ;;  %v246_v50 = vld [vmem:[%s2480_s1 + $0x568] sm:$0xff] }
  0x4a   :  { %1507 = vmatpush3.bf16.msra.mxu0 %v1506_v47  ;;  %606 = vmatmul.mubr.f32.gmra.mrb[10].mxu1 %v40_v48  ;;  %v1554_v46 = vpack.c.bf16 %v244_v39, %v243_v37  ;;  %v1524_v47 = vpack.c.bf16 %v230_v41, %v229_v40  ;;  %v214_v48 = vld [vmem:[%s2480_s1 + $0x468] sm:$0xff] }
  0x4b   :  { %525 = vmatprep.mubr.f32.mxu0 %v52_v51  ;;  %1539 = vmatpush3.bf16.msra.mxu1 %v1538_v52  ;;  %v1556_v51 = vpack.c.bf16 %v262_v43, %v261_v42  ;;  %v231_v52 = vld [vmem:[%s2480_s1 + $0x4f0] sm:$0xff] }
  0x4c   :  { %1509 = vmatprep.subr.bf16.mxu0 %v1508_v56  ;;  %610 = vmatprep.mubr.f32.mxu1 %v54_v57 }
  0x4d   :  { %526 = vmatmul.mubr.f32.gmra.mrb[12].mxu0 %v51_v55  ;;  %1541 = vmatprep.subr.bf16.mxu1 %v1540_v61 }
  0x4e   :  { %1511 = vmatpush3.bf16.msra.mxu0 %v1510_v0  ;;  %611 = vmatmul.mubr.f32.gmra.mrb[12].mxu1 %v53_v60 }
  0x4f   :  { %530 = vmatprep.mubr.f32.mxu0 %v65_v1  ;;  %1543 = vmatpush3.bf16.msra.mxu1 %v1542_v4 }
  0x50   :  { %1513 = vmatprep.subr.bf16.mxu0 %v1512_v8  ;;  %615 = vmatprep.mubr.f32.mxu1 %v67_v12 }
  0x51   :  { %531 = vmatmul.mubr.f32.gmra.mrb[14].mxu0 %v64_v16  ;;  %1545 = vmatprep.subr.bf16.mxu1 %v1544_v13 }
  0x52   :  { %1515 = vmatpush3.bf16.msra.mxu0 %v1514_v17  ;;  %616 = vmatmul.mubr.f32.gmra.mrb[14].mxu1 %v66_v18 }
  0x53   :  { %1547 = vmatpush3.bf16.msra.mxu1 %v1546_v19  ;;  %1517 = vmatprep.subr.bf16.mxu0 %v1516_v20 }
  0x54   :  { %1549 = vmatprep.subr.bf16.mxu1 %v1548_v24  ;;  %685 = vmatprep.mubr.f32.mxu0 %v30_v30 }
  0x55   :  { %770 = vmatprep.mubr.f32.mxu1 %v32_v32 }
  0x56   :  { %1519 = vmatpush3.bf16.msra.mxu0 %v1518_v31 }
  0x57   :  { %1551 = vmatpush3.bf16.msra.mxu1 %v1550_v33  ;;  %1521 = vmatprep.subr.bf16.mxu0 %v1520_v34 }
  0x58   :  { %1553 = vmatprep.subr.bf16.mxu1 %v1552_v38 }
  0x59   :  { %10 = vsyncpa [#allocation3], 0  ;;  %v263_v54 = vld [vmem:[%s2480_s1 + $0x5f0] sm:$0xff]  ;;  %v264_v55 = vld [vmem:[%s2480_s1 + $0x5f8] sm:$0xff]  ;;  %v1526_v56 = vpack.c.bf16 %v214_v48, %v213_v45  ;;  %v1558_v57 = vpack.c.bf16 %v246_v50, %v245_v49  ;;  %v1528_v58 = vpack.c.bf16 %v232_v53, %v231_v52  ;;  %vm1631_vm0 = vmmov 0   ;;  %s1633_s21 = smov [#allocation2]  }
  0x5a   :  { %1523 = vmatpush3.bf16.msra.mxu0 %v1522_v44  ;;  %v215_v59 = vld [vmem:[%s2480_s1 + $0x470] sm:$0xff]  ;;  %v216_v60 = vld [vmem:[%s2480_s1 + $0x478] sm:$0xff]  ;;  %v1560_v62 = vpack.c.bf16 %v264_v55, %v263_v54  ;;  %v265_v0 = vld [vmem:[%s2480_s1 + $0x600] sm:$0xff]  ;;  %vm876_vm1 = vcmask 261120   ;;  %vm936_vm2 = vcmask 1041409   ;;  %vm939_vm3 = vcmask 1042434  }
  0x5b   :  { %1555 = vmatpush3.bf16.msra.mxu1 %v1554_v46  ;;  %1525 = vmatprep.subr.bf16.mxu0 %v1524_v47  ;;  %v247_v61 = vld [vmem:[%s2480_s1 + $0x570] sm:$0xff]  ;;  %v248_v63 = vld [vmem:[%s2480_s1 + $0x578] sm:$0xff]  ;;  %v266_v1 = vld [vmem:[%s2480_s1 + $0x608] sm:$0xff]  ;;  %v1530_v2 = vpack.c.bf16 %v216_v60, %v215_v59  ;;  %v1630_v47 = vmov 0.0|0.0   ;;  %vm942_vm4 = vcmask 1043459   ;;  %s1023_s22 = sshll.u32 %s1633_s21, 4  ;;  %s1024_s22 = int_to_ptr.vmem [resolvable:$true] %s1023_s22 }
  0x5c   :  { %1557 = vmatprep.subr.bf16.mxu1 %v1556_v51  ;;  %v1562_v3 = vpack.c.bf16 %v248_v63, %v247_v61  ;;  %v1564_v4 = vpack.c.bf16 %v266_v1, %v265_v0  ;;  %v267_v5 = vld [vmem:[%s2480_s1 + $0x610] sm:$0xff]  ;;  %v268_v6 = vld [vmem:[%s2480_s1 + $0x618] sm:$0xff]  ;;  %v29_v7 = vld [vmem:[%s2479_s0 + $0x40] sm:$0xff]  ;;  %v1632_v51 = vmov 0.0   ;;  %s1606_s23 = scalar_lea.vmem %s1024_s22, 64  ;;  %p1611_p1 = scmp.lt.s32.totalorder %s1024_s22, %s1024_s22 }
  0x5d   :  { %v31_v8 = vld [vmem:[%s2479_s0 + $0x50] sm:$0xff]  ;;  %v1568_v9 = vpack.c.bf16 %v268_v6, %v267_v5  ;;  %v269_v11 = vld [vmem:[%s2480_s1 + $0x620] sm:$0xff]  ;;  %v270_v12 = vld [vmem:[%s2480_s1 + $0x628] sm:$0xff]  ;;  %p1607_p0 = scmp.ne.s32.totalorder %s1024_s22, %s1606_s23  ;;  %p1612_p2 = scmp.lt.s32.totalorder %s1606_s23, %s1606_s23 }
  0x5e   :  { %1527 = vmatpush3.bf16.msra.mxu0 %v1526_v56  ;;  %v43_v10 = vld [vmem:[%s2479_s0 + $0xb0] sm:$0xff]  ;;  %v45_v13 = vld [vmem:[%s2479_s0 + $0xc0] sm:$0xff]  ;;  %v42_v14 = vld [vmem:[%s2479_s0 + $0xa8] sm:$0xff]  ;;  %v1572_v16 = vpack.c.bf16 %v270_v12, %v269_v11 }
  0x5f   :  { %1559 = vmatpush3.bf16.msra.mxu1 %v1558_v57  ;;  %1529 = vmatprep.subr.bf16.mxu0 %v1528_v58  ;;  %v44_v15 = vld [vmem:[%s2479_s0 + $0xb8] sm:$0xff]  ;;  %v271_v18 = vld [vmem:[%s2480_s1 + $0x630] sm:$0xff]  ;;  %v58_v20 = vld [vmem:[%s2479_s0 + $0x128] sm:$0xff]  ;;  %p1613_p3 = por %p1612_p2, %p1611_p1 }
  0x60   :  { %1561 = vmatprep.subr.bf16.mxu1 %v1560_v62  ;;  %v56_v17 = vld [vmem:[%s2479_s0 + $0x118] sm:$0xff]  ;;  %v55_v21 = vld [vmem:[%s2479_s0 + $0x110] sm:$0xff]  ;;  %v57_v22 = vld [vmem:[%s2479_s0 + $0x120] sm:$0xff] }
  0x61   :  { %v272_v19 = vld [vmem:[%s2480_s1 + $0x638] sm:$0xff]  ;;  %v69_v24 = vld [vmem:[%s2479_s0 + $0x180] sm:$0xff]  ;;  %v274_v26 = vld [vmem:[%s2480_s1 + $0x648] sm:$0xff]  ;;  %p1614_p4 = pnand %p1613_p3, %p1607_p0 }
  0x62   :  { %1531 = vmatpush3.bf16.msra.mxu0 %v1530_v2  ;;  %v1576_v23 = vpack.c.bf16 %v272_v19, %v271_v18  ;;  %v273_v25 = vld [vmem:[%s2480_s1 + $0x640] sm:$0xff]  ;;  %v71_v27 = vld [vmem:[%s2479_s0 + $0x190] sm:$0xff]  ;;  %v68_v28 = vld [vmem:[%s2479_s0 + $0x178] sm:$0xff] }
  0x63   :  { %1563 = vmatpush3.bf16.msra.mxu1 %v1562_v3  ;;  %1565 = vmatprep.subr.bf16.mxu0 %v1564_v4  ;;  %v70_v29 = vld [vmem:[%s2479_s0 + $0x188] sm:$0xff]  ;;  %v1580_v30 = vpack.c.bf16 %v274_v26, %v273_v25  ;;  %v275_v31 = vld [vmem:[%s2480_s1 + $0x650] sm:$0xff]  ;;  %v276_v32 = vld [vmem:[%s2480_s1 + $0x658] sm:$0xff] }
  0x64   :  { %v33_v33 = vld [vmem:[%s2479_s0 + $0x60] sm:$0xff]  ;;  %v1584_v34 = vpack.c.bf16 %v276_v32, %v275_v31  ;;  %v278_v36 = vld [vmem:[%s2480_s1 + $0x668] sm:$0xff]  ;;  %v279_v38 = vld [vmem:[%s2480_s1 + $0x670] sm:$0xff]  ;;  %1596 = vmatprep.subr.bf16.mxu1 %v1630_v47 }
  0x65   :  { %686 = vmatmul.mubr.f32.vlgmr.msra.gmra.mrb[16].mxu0 %v29_v7  ;;  %v277_v35 = vld [vmem:[%s2480_s1 + $0x660] sm:$0xff]  ;;  %v280_v39 = vld [vmem:[%s2480_s1 + $0x678] sm:$0xff]  ;;  %v46_v41 = vld [vmem:[%s2479_s0 + $0xc8] sm:$0xff] }
  0x66   :  { %1567 = vmatpush3.bf16.msra.mxu0 %v1564_v4  ;;  %771 = vmatmul.mubr.f32.vlgmr.msra.gmra.mrb[16].mxu1 %v31_v8  ;;  %v1588_v37 = vpack.c.bf16 %v278_v36, %v277_v35  ;;  %v1592_v40 = vpack.c.bf16 %v280_v39, %v279_v38  ;;  %v59_v42 = vld [vmem:[%s2479_s0 + $0x130] sm:$0xff]  ;;  %v72_v43 = vld [vmem:[%s2479_s0 + $0x198] sm:$0xff]  ;;  %v920_v44 = vld [vmem:[%s2482_s3] sm:$0xff] }
  0x67   :  { %690 = vmatprep.mubr.f32.mxu0 %v43_v10  ;;  %1569 = vmatprep.subr.bf16.mxu0 %v1568_v9  ;;  %v921_v45 = vld [vmem:[%s2482_s3 + $0x8] sm:$0xff]  ;;  %v922_v48 = vld [vmem:[%s2482_s3 + $0x10] sm:$0xff]  ;;  %v923_v49 = vld [vmem:[%s2482_s3 + $0x18] sm:$0xff] }
  0x68   :  { %775 = vmatprep.mubr.f32.mxu1 %v45_v13  ;;  %v1597_v46 = vpack.c.bf16 %v921_v45, %v920_v44  ;;  %v1600_v50 = vpack.c.bf16 %v923_v49, %v922_v48 }
  0x69   :  { %691 = vmatmul.mubr.f32.gmra.mrb[18].mxu0 %v42_v14 }
  0x6a   :  { %1571 = vmatpush3.bf16.msra.mxu0 %v1568_v9  ;;  %776 = vmatmul.mubr.f32.gmra.mrb[18].mxu1 %v44_v15 }
  0x6b   :  { %695 = vmatprep.mubr.f32.mxu0 %v56_v17  ;;  %1573 = vmatprep.subr.bf16.mxu0 %v1572_v16 }
  0x6c   :  { %780 = vmatprep.mubr.f32.mxu1 %v58_v20  ;;  %1598 = vmatpush3.bf16.msra.mxu1 %v1597_v46 }
  0x6d   :  { %696 = vmatmul.mubr.f32.gmra.mrb[20].mxu0 %v55_v21  ;;  %1599 = vmatprep.subr.bf16.mxu1 %v1630_v47 }
  0x6e   :  { %1575 = vmatpush3.bf16.msra.mxu0 %v1572_v16  ;;  %781 = vmatmul.mubr.f32.gmra.mrb[20].mxu1 %v57_v22 }
  0x6f   :  { %700 = vmatprep.mubr.f32.mxu0 %v69_v24  ;;  %1577 = vmatprep.subr.bf16.mxu0 %v1576_v23 }
  0x70   :  { %785 = vmatprep.mubr.f32.mxu1 %v71_v27  ;;  %1601 = vmatpush3.bf16.msra.mxu1 %v1600_v50 }
  0x71   :  { %701 = vmatmul.mubr.f32.gmra.mrb[22].mxu0 %v68_v28 }
  0x72   :  { %1579 = vmatpush3.bf16.msra.mxu0 %v1576_v23  ;;  %786 = vmatmul.mubr.f32.gmra.mrb[22].mxu1 %v70_v29 }
  0x73   :  { %1581 = vmatprep.subr.bf16.mxu0 %v1580_v30  ;;  %1355 = vmatprep.mubr.f32.mxu0 %v33_v33 }
  0x74   :  { %1369 = vmatprep.mubr.msk.f32.mxu1 %vm1631_vm0, %v1632_v51 }
  0x76   :  { %1583 = vmatpush3.bf16.msra.mxu0 %v1580_v30 }
  0x77   :  { %1585 = vmatprep.subr.bf16.mxu0 %v1584_v34 }
  0x7a   :  { %1587 = vmatpush3.bf16.msra.mxu0 %v1584_v34 }
  0x7b   :  { %1589 = vmatprep.subr.bf16.mxu0 %v1588_v37 }
  0x7e   :  { %1591 = vmatpush3.bf16.msra.mxu0 %v1588_v37 }
  0x7f   :  { %1593 = vmatprep.subr.bf16.mxu0 %v1592_v40 }
  0x82   :  { %1595 = vmatpush3.bf16.msra.mxu0 %v1592_v40 }
  0x85   :  { %1356 = vmatmul.mubr.f32.vlgmr.msra.gmra.mrb[24].mxu0 %v46_v41 }
  0x86   :  { %1358 = vmatprep.mubr.f32.mxu0 %v59_v42 }
  0x89   :  { %1359 = vmatmul.mubr.f32.gmra.mrb[26].mxu0 %v72_v43 }
  0xf8   :  { %v1066_v52 = vpop.f32.mrb[0].mxu0 }
  0xf9   :  { %v1110_v53 = vpop.f32.mrb[0].mxu1  ;;  %v1067_v54 = vpop.f32.mrb[1].mxu0 }
  0xfa   :  { %v1068_v55 = vadd.f32 %v1067_v54, %v1066_v52  ;;  %v1111_v56 = vpop.f32.mrb[1].mxu1 }
  0xfb   :  { %v1112_v57 = vadd.f32 %v1111_v56, %v1110_v53 }
  0xfc   :  { %v1069_v58 = vpop.f32.mrb[2].mxu0 }
  0xfd   :  { %v433_v59 = vadd.f32 %v1112_v57, %v1068_v55  ;;  %v1113_v60 = vpop.f32.mrb[2].mxu1  ;;  %v1070_v61 = vpop.f32.mrb[3].mxu0 }
  0xfe   :  { %v1071_v62 = vadd.f32 %v1070_v61, %v1069_v58  ;;  %v1114_v63 = vpop.f32.mrb[3].mxu1 }
  0xff   :  { %v1115_v0 = vadd.f32 %v1114_v63, %v1113_v60 }
 0x100   :  { %v1072_v1 = vpop.f32.mrb[4].mxu0 }
 0x101   :  { %v438_v2 = vadd.f32 %v1115_v0, %v1071_v62  ;;  %v1116_v3 = vpop.f32.mrb[4].mxu1  ;;  %v1073_v4 = vpop.f32.mrb[5].mxu0 }
 0x102   :  { %v1074_v5 = vadd.f32 %v1073_v4, %v1072_v1  ;;  %v1117_v6 = vpop.f32.mrb[5].mxu1 }
 0x103   :  { %v1118_v7 = vadd.f32 %v1117_v6, %v1116_v3 }
 0x104   :  { %v1075_v8 = vpop.f32.mrb[6].mxu0 }
 0x105   :  { %v443_v9 = vadd.f32 %v1118_v7, %v1074_v5  ;;  %v1119_v10 = vpop.f32.mrb[6].mxu1  ;;  %v1076_v11 = vpop.f32.mrb[7].mxu0 }
 0x106   :  { %v1077_v12 = vadd.f32 %v1076_v11, %v1075_v8  ;;  %v1120_v13 = vpop.f32.mrb[7].mxu1 }
 0x107   :  { %v1121_v14 = vadd.f32 %v1120_v13, %v1119_v10 }
 0x109   :  { %v448_v15 = vadd.f32 %v1121_v14, %v1077_v12 }
 0x118   :  { %v1154_v16 = vpop.f32.mrb[8].mxu0 }
 0x119   :  { %v1155_v17 = vpop.f32.mrb[9].mxu0  ;;  %v1198_v18 = vpop.f32.mrb[8].mxu1 }
 0x11a   :  { %v1156_v19 = vadd.f32 %v1155_v17, %v1154_v16  ;;  %v1199_v20 = vpop.f32.mrb[9].mxu1 }
 0x11b   :  { %v1200_v21 = vadd.f32 %v1199_v20, %v1198_v18 }
 0x11c   :  { %v518_v22 = vadd.f32 %v1156_v19, %v433_v59  ;;  %v1157_v23 = vpop.f32.mrb[10].mxu0 }
 0x11d   :  { %v1158_v24 = vpop.f32.mrb[11].mxu0  ;;  %v1201_v25 = vpop.f32.mrb[10].mxu1 }
 0x11e   :  { %v603_v26 = vadd.f32 %v1200_v21, %v518_v22  ;;  %v1159_v27 = vadd.f32 %v1158_v24, %v1157_v23  ;;  %v1202_v28 = vpop.f32.mrb[11].mxu1 }
 0x11f   :  { %v1203_v29 = vadd.f32 %v1202_v28, %v1201_v25 }
 0x120   :  { %v523_v30 = vadd.f32 %v1159_v27, %v438_v2  ;;  %v1160_v31 = vpop.f32.mrb[12].mxu0 }
 0x121   :  { %v1161_v32 = vpop.f32.mrb[13].mxu0  ;;  %v1204_v33 = vpop.f32.mrb[12].mxu1 }
 0x122   :  { %v608_v34 = vadd.f32 %v1203_v29, %v523_v30  ;;  %v1162_v35 = vadd.f32 %v1161_v32, %v1160_v31  ;;  %v1205_v36 = vpop.f32.mrb[13].mxu1 }
 0x123   :  { %v1206_v37 = vadd.f32 %v1205_v36, %v1204_v33 }
 0x124   :  { %v528_v38 = vadd.f32 %v1162_v35, %v443_v9  ;;  %v1163_v39 = vpop.f32.mrb[14].mxu0 }
 0x125   :  { %v1164_v40 = vpop.f32.mrb[15].mxu0  ;;  %v1207_v41 = vpop.f32.mrb[14].mxu1 }
 0x126   :  { %v613_v42 = vadd.f32 %v1206_v37, %v528_v38  ;;  %v1165_v43 = vadd.f32 %v1164_v40, %v1163_v39  ;;  %v1208_v44 = vpop.f32.mrb[15].mxu1 }
 0x127   :  { %v1209_v45 = vadd.f32 %v1208_v44, %v1207_v41 }
 0x128   :  { %v533_v46 = vadd.f32 %v1165_v43, %v448_v15 }
 0x12a   :  { %v618_v47 = vadd.f32 %v1209_v45, %v533_v46 }
 0x138   :  { %v1242_v48 = vpop.f32.mrb[16].mxu0 }
 0x139   :  { %v1243_v49 = vpop.f32.mrb[17].mxu0  ;;  %v1286_v50 = vpop.f32.mrb[16].mxu1 }
 0x13a   :  { %v1244_v51 = vadd.f32 %v1243_v49, %v1242_v48  ;;  %v1287_v52 = vpop.f32.mrb[17].mxu1 }
 0x13b   :  { %v1288_v53 = vadd.f32 %v1287_v52, %v1286_v50 }
 0x13c   :  { %v688_v54 = vadd.f32 %v1244_v51, %v603_v26  ;;  %v1245_v55 = vpop.f32.mrb[18].mxu0 }
 0x13d   :  { %v1246_v56 = vpop.f32.mrb[19].mxu0  ;;  %v1289_v57 = vpop.f32.mrb[18].mxu1 }
 0x13e   :  { %v1247_v58 = vadd.f32 %v1246_v56, %v1245_v55  ;;  %v1290_v59 = vpop.f32.mrb[19].mxu1  ;;  %v773_v60 = vadd.f32 %v1288_v53, %v688_v54 }
 0x13f   :  { %v1291_v61 = vadd.f32 %v1290_v59, %v1289_v57 }
 0x140   :  { %v693_v62 = vadd.f32 %v1247_v58, %v608_v34  ;;  %v1248_v63 = vpop.f32.mrb[20].mxu0 }
 0x141   :  { %v1249_v0 = vpop.f32.mrb[21].mxu0  ;;  %v1292_v1 = vpop.f32.mrb[20].mxu1 }
 0x142   :  { %v1250_v2 = vadd.f32 %v1249_v0, %v1248_v63  ;;  %v1293_v3 = vpop.f32.mrb[21].mxu1  ;;  %v778_v4 = vadd.f32 %v1291_v61, %v693_v62 }
 0x143   :  { %v1294_v5 = vadd.f32 %v1293_v3, %v1292_v1  ;;  %v1032_v3 = vld [vmem:[%s2483_s4] ss:$0 sm:$0xff] }
 0x144   :  { %v698_v6 = vadd.f32 %v1250_v2, %v613_v42  ;;  %v1251_v7 = vpop.f32.mrb[22].mxu0  ;;  %v1031_v42 = vld [vmem:[%s2481_s2] ss:$0 sm:$0xff] }
 0x145   :  { %v1252_v8 = vpop.f32.mrb[23].mxu0  ;;  %v1295_v9 = vpop.f32.mrb[22].mxu1 }
 0x146   :  { %v1253_v10 = vadd.f32 %v1252_v8, %v1251_v7  ;;  %v1296_v11 = vpop.f32.mrb[23].mxu1  ;;  %v783_v12 = vadd.f32 %v1294_v5, %v698_v6 }
 0x147   :  { %v1297_v13 = vadd.f32 %v1296_v11, %v1295_v9 }
 0x148   :  { %v703_v14 = vadd.f32 %v1253_v10, %v618_v47 }
 0x14a   :  { %v788_v15 = vadd.f32 %v1297_v13, %v703_v14 }
 0x158   :  { %v1357_v16 = vpop.f32.mrb[24].mxu0 }
 0x159   :  { %v863_v17 = vadd.f32 %v1357_v16, %v778_v4  ;;  %v857_v18 = vpop.f32.mrb[25].mxu0 }
 0x15a   :  { %v858_v19 = vadd.f32 %v857_v18, %v773_v60 }
 0x15b   :  { %v884_v20 = vsel %vm876_vm1, %v863_v17, 0.0 }
 0x15c   :  { %v885_v21 = vrot.slane %v884_v20, 4  ;;  %v877_v22 = vsel %vm876_vm1, %v858_v19, 0.0  ;;  %v1360_v23 = vpop.f32.mrb[26].mxu0 }
 0x15d   :  { %v878_v24 = vrot.slane %v877_v22, 4  ;;  %v873_v25 = vadd.f32 %v1360_v23, %v788_v15  ;;  %v867_v26 = vpop.f32.mrb[27].mxu0 }
 0x15e   :  { %v886_v27 = vadd.f32 %v885_v21, %v884_v20  ;;  %v868_v28 = vadd.f32 %v867_v26, %v783_v12 }
 0x15f   :  { %v879_v29 = vadd.f32 %v878_v24, %v877_v22  ;;  %v898_v30 = vsel %vm876_vm1, %v873_v25, 0.0 }
 0x160   :  { %v887_v31 = vrot.slane %v886_v27, 2  ;;  %v899_v32 = vrot.slane %v898_v30, 4  ;;  %v891_v33 = vsel %vm876_vm1, %v868_v28, 0.0 }
 0x161   :  { %v880_v34 = vrot.slane %v879_v29, 2  ;;  %v892_v35 = vrot.slane %v891_v33, 4 }
 0x162   :  { %v888_v36 = vadd.f32 %v887_v31, %v886_v27  ;;  %v900_v37 = vadd.f32 %v899_v32, %v898_v30 }
 0x163   :  { %v881_v38 = vadd.f32 %v880_v34, %v879_v29  ;;  %v893_v39 = vadd.f32 %v892_v35, %v891_v33 }
 0x164   :  { %v889_v40 = vrot.slane %v888_v36, 1  ;;  %v901_v41 = vrot.slane %v900_v37, 2 }
 0x165   :  { %v882_v43 = vrot.slane %v881_v38, 1  ;;  %v894_v44 = vrot.slane %v893_v39, 2 }
 0x166   :  { %v890_v45 = vadd.f32 %v889_v40, %v888_v36  ;;  %v902_v46 = vadd.f32 %v901_v41, %v900_v37 }
 0x167   :  { %v883_v47 = vadd.f32 %v882_v43, %v881_v38  ;;  %v895_v48 = vadd.f32 %v894_v44, %v893_v39 }
 0x168   :  { %v913_v49 = vadd.f32 %v1031_v42, %v890_v45  ;;  %v903_v50 = vrot.slane %v902_v46, 1 }
 0x169   :  { %v912_v51 = vadd.f32 %v1031_v42, %v883_v47  ;;  %v896_v52 = vrot.slane %v895_v48, 1 }
 0x16a   :  { %v917_v53 = vmax.f32 %v913_v49, 0.0  ;;  %v904_v54 = vadd.f32 %v903_v50, %v902_v46 }
 0x16b   :  { %v916_v55 = vmax.f32 %v912_v51, 0.0  ;;  %v897_v56 = vadd.f32 %v896_v52, %v895_v48 }
 0x16c   :  { %v935_v57 = vrot.slane %v917_v53, 7  ;;  %v915_v58 = vadd.f32 %v1031_v42, %v904_v54 }
 0x16d   :  { %v914_v59 = vadd.f32 %v1031_v42, %v897_v56 }
 0x16e   :  { %v919_v60 = vmax.f32 %v915_v58, 0.0  ;;  %v937_v61 = vsel %vm936_vm2, %v935_v57, %v916_v55 }
 0x16f   :  { %v918_v62 = vmax.f32 %v914_v59, 0.0 }
 0x170   :  { %v941_v0 = vrot.slane %v919_v60, 5 }
 0x171   :  { %v938_v63 = vrot.slane %v918_v62, 6 }
 0x173   :  { %v940_v1 = vsel %vm939_vm3, %v938_v63, %v937_v61 }
 0x174   :  { %v943_v2 = vsel %vm942_vm4, %v941_v0, %v940_v1 }
 0x175   :  { %1370 = vmatmul.mubr.msk.f32.vlgmr.msra.gmra.mrb[24].mxu1 %vm876_vm1, %v943_v2 }
 0x248   :  { %v1012_v4 = vpop.f32.mrb[24].mxu1 }
 0x249   :  { %v1013_v5 = vadd.f32 %v1032_v3, %v1012_v4  ;;  %v1371_v6 = vpop.f32.mrb[25].mxu1 }
 0x24b   :  { %1016 = vst [vmem:[#allocation2] sm:$0xf] %v1013_v5 }
 0x24c   :  { %1617 = shalt.err (!%p1614_p4)
}
 0x24d   :  { %s1618_s26 = scalar_lea.hbm %s2484_s5, 64 }
 0x24e   :  { %p1619_p5 = scmp.ne.s32.totalorder %s2484_s5, %s1618_s26  ;;  %p1622_p6 = scmp.lt.u32.totalorder %s1618_s26, %s2484_s5 }
 0x250   :  { %p1624_p7 = pnand %p1622_p6, %p1619_p5 }
 0x252   :  { %1627 = shalt.err (!%p1624_p7)
}
 0x253   :  { %1026 = dma.vmem_to_hbm [thread:$0]  %s1024_s22, 64, %s2484_s5, [#allocation3]  }
 0x254   :  { %1628 = dma.done.wait [#allocation3], 64  }
 0x255   :  { %1629 = vsyncadd [#allocation3], 4294967232 }
 0x256   :  { %1030 = vsyncpa [#allocation3], 1 }

</bundles_post_ra>
